<compile_context>
chip_gen: v5e
topology: v5e:2x2
jax: 0.10.0
libtpu: 0.0.40
codegen_flags: <defaults>
</compile_context>

<pallas_src>
import functools

import jax
import jax.numpy as jnp
from jax.experimental import pallas as pl
from jax.experimental.pallas import tpu as pltpu

LN_EPS = 1e-5   # PyTorch nn.LayerNorm default eps
LANE = 128


def _rup(x, m):
    return ((x + m - 1) // m) * m


def _pad2(a, rows, cols):
    out = jnp.zeros((rows, cols), jnp.float32)
    return out.at[: a.shape[0], : a.shape[1]].set(a)


def icm_kernel(obs_ref, nobs_ref, act_ref, wt_ref, wn_ref, pb_ref, err_ref, *,
               rep_dim, act_r, wide, offs):
    """One batch tile of the ICM forward pass.

    obs_ref / nobs_ref : (TB, obs_dim) f32
    act_ref            : (TB, act_dim) f32 (unpadded; padded in-kernel)
    wt_ref             : (obs_r, W)   bf16  trunk weight (zero-padded)
    wn_ref             : (KR, NW)     bf16  packed net-weight slab
    pb_ref             : (8, NW)      f32   packed bias / gamma / beta slab
    err_ref            : (TB, 2)      f32   [forward_error, backward_error]
    """
    TB = obs_ref.shape[0]
    act_dim = act_ref.shape[1]
    W = wt_ref.shape[1]                      # padded feature width (>= 128)
    f32, bf16 = jnp.float32, jnp.bfloat16

    def nblk(name, nrows):
        o = offs[name]
        return wn_ref[o:o + nrows, :]        # static slab slice (zero cost)

    # ---- bias / LayerNorm parameter rows -------------------------------
    if wide:
        bt = pb_ref[0:1, 0:W]
        gamma = pb_ref[1:2, 0:W]
        beta = pb_ref[2:3, 0:W]
        b1 = pb_ref[3:4, :]                  # (1, 2W) = [bf1 | bb1]
        b2 = pb_ref[4:5, :]                  # (1, 2W) = [bf2 | bb2]
    else:
        bt, gamma, beta = pb_ref[0:1, :], pb_ref[1:2, :], pb_ref[2:3, :]
        bf1, bf2 = pb_ref[3:4, :], pb_ref[4:5, :]
        bb1, bb2 = pb_ref[5:6, :], pb_ref[6:7, :]

    lane = jax.lax.broadcasted_iota(jnp.int32, (1, W), 1)
    ln_mask = (lane < rep_dim).astype(f32)   # real LayerNorm lanes
    wt = wt_ref[...]

    # ---- trunk: Linear -> LayerNorm -> Tanh (padded lanes end up exactly 0) --
    def trunk(x):
        h = jnp.dot(x.astype(bf16), wt, preferred_element_type=f32) + bt
        mu = jnp.sum(h, axis=-1, keepdims=True) * (1.0 / rep_dim)
        d = h - mu
        var = jnp.sum(d * d * ln_mask, axis=-1, keepdims=True) * (1.0 / rep_dim)
        return jnp.tanh(d * jax.lax.rsqrt(var + LN_EPS) * gamma + beta)

    z = trunk(obs_ref[...])                  # (TB, W)
    zn = trunk(nobs_ref[...])                # (TB, W)

    # ---- pad action lanes in-kernel (no wrapper XLA op) ----------------------
    act = act_ref[...]
    if act_dim != act_r:
        act = jnp.concatenate(
            [act, jnp.zeros((TB, act_r - act_dim), f32)], axis=1)

    zb, znb, ab = z.astype(bf16), zn.astype(bf16), act.astype(bf16)

    if wide:
        # layer 1 of forward_net and backward_net fused into N=2W dots:
        #   lanes [0,W)  -> forward_net hidden,  lanes [W,2W) -> backward_net hidden
        h12 = (jnp.dot(zb, nblk("l1z", W), preferred_element_type=f32)
               + jnp.dot(znb, nblk("l1n", W), preferred_element_type=f32)
               + jnp.dot(ab, nblk("l1a", act_r), preferred_element_type=f32)
               + b1)
        h12 = jnp.maximum(h12, 0.0)
        # layer 2: single block-diagonal (2W, 2W) dot
        out2 = jnp.dot(h12.astype(bf16), nblk("l2", 2 * W),
                       preferred_element_type=f32) + b2
        zn_hat = out2[:, :W]                         # padded lanes == 0
        a_hat = jnp.tanh(out2[:, W:2 * W])           # padded lanes -> tanh(0) = 0
    else:
        # 128x128-MXU chips (v2..v5): keep separate 128-wide dots
        h1 = (jnp.dot(zb, nblk("f1o", W), preferred_element_type=f32)
              + jnp.dot(ab, nblk("f1a", act_r), preferred_element_type=f32)
              + bf1)
        h1 = jnp.maximum(h1, 0.0)
        zn_hat = jnp.dot(h1.astype(bf16), nblk("f2", W),
                         preferred_element_type=f32) + bf2
        h2 = (jnp.dot(zb, nblk("b1o", W), preferred_element_type=f32)
              + jnp.dot(znb, nblk("b1n", W), preferred_element_type=f32)
              + bb1)
        h2 = jnp.maximum(h2, 0.0)
        a_hat = jnp.tanh(jnp.dot(h2.astype(bf16), nblk("b2", W),
                                 preferred_element_type=f32) + bb2)

    # ---- L2 error norms (padded lanes contribute exactly zero) ---------------
    fd = zn - zn_hat                                   # (TB, W)
    bd = act - a_hat[:, :act_r]                        # (TB, act_r)
    ferr = jnp.sqrt(jnp.sum(fd * fd, axis=-1, keepdims=True))
    berr = jnp.sqrt(jnp.sum(bd * bd, axis=-1, keepdims=True))
    lane2 = jax.lax.broadcasted_iota(jnp.int32, (TB, 2), 1)
    err_ref[...] = jnp.where(lane2 == 0, ferr, berr)   # single merged store


def init_params(key, obs_dim, action_dim, hidden_dim, icm_rep_dim, *,
                wide=True, w_dtype=jnp.bfloat16):
    """Deterministic synthetic init (stands in for utils.weight_init), packed
    into kernel-ready slabs.  Also returns natural (unpacked f32) params for
    the pure-JAX reference."""
    ks = jax.random.split(key, 5)

    def lin(k, din, dout):
        scale = 1.0 / jnp.sqrt(jnp.float32(din))
        w = jax.random.normal(k, (din, dout), jnp.float32) * scale
        b = jnp.zeros((dout,), jnp.float32)
        return w, b

    wt, bt = lin(ks[0], obs_dim, icm_rep_dim)
    gamma = jnp.ones((icm_rep_dim,), jnp.float32)
    beta = jnp.zeros((icm_rep_dim,), jnp.float32)
    wf1, bf1 = lin(ks[1], icm_rep_dim + action_dim, hidden_dim)
    wf2, bf2 = lin(ks[2], hidden_dim, icm_rep_dim)
    wb1, bb1 = lin(ks[3], 2 * icm_rep_dim, hidden_dim)
    wb2, bb2 = lin(ks[4], hidden_dim, action_dim)

    natural = dict(wt=wt, bt=bt, gamma=gamma, beta=beta,
                   wf1=wf1, bf1=bf1, wf2=wf2, bf2=bf2,
                   wb1=wb1, bb1=bb1, wb2=wb2, bb2=bb2)

    # padded half-width (lanes) shared by rep/hidden/action; rows are 16-aligned
    W = max(LANE, _rup(icm_rep_dim, LANE), _rup(hidden_dim, LANE),
            _rup(action_dim, LANE))
    obs_r = _rup(obs_dim, 16)
    act_r = _rup(action_dim, 16)

    wf1_o, wf1_a = wf1[:icm_rep_dim], wf1[icm_rep_dim:]
    wb1_o, wb1_n = wb1[:icm_rep_dim], wb1[icm_rep_dim:]

    wt_slab = _pad2(wt, obs_r, W).astype(w_dtype)

    z0 = jnp.zeros((W, W), jnp.float32)
    if wide:
        NW = 2 * W
        blocks = [
            ("l1z", jnp.concatenate([_pad2(wf1_o, W, W), _pad2(wb1_o, W, W)], axis=1)),
            ("l1n", jnp.concatenate([z0, _pad2(wb1_n, W, W)], axis=1)),
            ("l1a", jnp.concatenate([_pad2(wf1_a, act_r, W),
                                     jnp.zeros((act_r, W), jnp.float32)], axis=1)),
            ("l2", jnp.concatenate([
                jnp.concatenate([_pad2(wf2, W, W), z0], axis=1),
                jnp.concatenate([z0, _pad2(wb2, W, W)], axis=1)], axis=0)),
        ]
        bias_rows = [
            _pad2(bt[None, :], 1, NW),
            _pad2(gamma[None, :], 1, NW),
            _pad2(beta[None, :], 1, NW),
            jnp.concatenate([_pad2(bf1[None, :], 1, W), _pad2(bb1[None, :], 1, W)], axis=1),
            jnp.concatenate([_pad2(bf2[None, :], 1, W), _pad2(bb2[None, :], 1, W)], axis=1),
        ]
    else:
        NW = W
        blocks = [
            ("f1o", _pad2(wf1_o, W, W)), ("f1a", _pad2(wf1_a, act_r, W)),
            ("f2", _pad2(wf2, W, W)), ("b1o", _pad2(wb1_o, W, W)),
            ("b1n", _pad2(wb1_n, W, W)), ("b2", _pad2(wb2, W, W)),
        ]
        bias_rows = [_pad2(v[None, :], 1, W)
                     for v in (bt, gamma, beta, bf1, bf2, bb1, bb2)]

    offs, parts, cur = {}, [], 0
    for name, blk in blocks:
        offs[name] = cur
        parts.append(blk)
        cur += blk.shape[0]
    wn_slab = jnp.concatenate(parts, axis=0).astype(w_dtype)

    pb_slab = jnp.concatenate(
        bias_rows + [jnp.zeros((8 - len(bias_rows), NW), jnp.float32)], axis=0)

    packed = dict(wt_slab=wt_slab, wn_slab=wn_slab, pb_slab=pb_slab, offs=offs,
                  rep_dim=icm_rep_dim, act_r=act_r, wide=wide)
    return packed, natural


def icm_forward(obs, action, next_obs, packed, *, max_tile_b=1024):
    assert obs.shape[0] == next_obs.shape[0]
    assert obs.shape[0] == action.shape[0]
    B, obs_dim = obs.shape
    act_dim = action.shape[1]
    assert B % 8 == 0, "batch must be a multiple of 8 (TPU sublane tile)"

    kind = jax.devices()[0].device_kind.lower()
    two_core = ("v7" in kind) or ("7x" in kind)

    # Tile selection: single-TC chips (v5e/v6e) -> fewest, biggest tiles;
    # v7x -> ensure >= 2 grid steps (when batch allows) so both TCs get work.
    cap = max_tile_b
    if two_core and B >= 16:
        cap = min(cap, max(8, (B // 2) // 8 * 8))
    tb = min(cap, B)
    while B % tb:
        tb -= 8
    grid = (B // tb,)

    wt_slab, wn_slab, pb_slab = packed["wt_slab"], packed["wn_slab"], packed["pb_slab"]
    kernel = functools.partial(
        icm_kernel, rep_dim=packed["rep_dim"], act_r=packed["act_r"],
        wide=packed["wide"], offs=packed["offs"])

    err = pl.pallas_call(
        kernel,
        out_shape=jax.ShapeDtypeStruct((B, 2), jnp.float32),
        grid_spec=pltpu.PrefetchScalarGridSpec(
            num_scalar_prefetch=0,
            grid=grid,
            in_specs=[
                pl.BlockSpec((tb, obs_dim), lambda i: (i, 0)),
                pl.BlockSpec((tb, obs_dim), lambda i: (i, 0)),
                pl.BlockSpec((tb, act_dim), lambda i: (i, 0)),
                # Constant block index -> parameters fetched once and kept
                # VMEM-resident across grid steps (no per-step re-DMA).
                pl.BlockSpec(wt_slab.shape, lambda i: (0, 0)),
                pl.BlockSpec(wn_slab.shape, lambda i: (0, 0)),
                pl.BlockSpec(pb_slab.shape, lambda i: (0, 0)),
            ],
            out_specs=pl.BlockSpec((tb, 2), lambda i: (i, 0)),
        ),
        compiler_params=pltpu.CompilerParams(
            dimension_semantics=("parallel",),   # batch tiles shard over 2 TCs on v7x
            vmem_limit_bytes=32 * 1024 * 1024,   # fits v5e/v6e/v7x budgets
        ),
    )(obs, next_obs, action, wt_slab, wn_slab, pb_slab)

    # Returned directly (no wrapper slice kernels):
    #   err[:, 0:1] = forward_error, err[:, 1:2] = backward_error
    return err


def icm_reference(obs, action, next_obs, nat):
    """Pure-JAX f32 reference matching the PyTorch module forward."""
    def trunk(x):
        h = x @ nat["wt"] + nat["bt"]
        mu = jnp.mean(h, axis=-1, keepdims=True)
        var = jnp.mean(jnp.square(h - mu), axis=-1, keepdims=True)
        return jnp.tanh((h - mu) / jnp.sqrt(var + LN_EPS) * nat["gamma"] + nat["beta"])

    z, zn = trunk(obs), trunk(next_obs)
    h1 = jax.nn.relu(jnp.concatenate([z, action], -1) @ nat["wf1"] + nat["bf1"])
    zn_hat = h1 @ nat["wf2"] + nat["bf2"]
    h2 = jax.nn.relu(jnp.concatenate([z, zn], -1) @ nat["wb1"] + nat["bb1"])
    a_hat = jnp.tanh(h2 @ nat["wb2"] + nat["bb2"])
    ferr = jnp.sqrt(jnp.sum(jnp.square(zn - zn_hat), -1, keepdims=True))
    berr = jnp.sqrt(jnp.sum(jnp.square(action - a_hat), -1, keepdims=True))
    return ferr, berr


if __name__ == "__main__":
    B, obs_dim, action_dim, hidden_dim, icm_rep_dim = 8, 32, 8, 64, 16

    # 256-wide MXU packing helps v6e/v7x; keep 128-wide dots on 128x128-MXU chips.
    kind = jax.devices()[0].device_kind.lower()
    wide = not any(v in kind for v in ("v2", "v3", "v4", "v5"))

    key = jax.random.PRNGKey(0)
    kp, ko, ka, kn = jax.random.split(key, 4)

    packed, natural = init_params(kp, obs_dim, action_dim, hidden_dim,
                                  icm_rep_dim, wide=wide)
    obs = jax.random.normal(ko, (B, obs_dim), jnp.float32)
    action = jax.random.uniform(ka, (B, action_dim), jnp.float32, -1.0, 1.0)
    next_obs = jax.random.normal(kn, (B, obs_dim), jnp.float32)

    err = icm_forward(obs, action, next_obs, packed)
    jax.block_until_ready(err)
    assert err.shape == (B, 2)

    # test-only split + loose parity check vs f32 reference (kernel matmuls use
    # bf16 operands with f32 accumulation; all epilogue math is f32)
    ferr, berr = err[:, 0:1], err[:, 1:2]
    ferr_ref, berr_ref = icm_reference(obs, action, next_obs, natural)
    assert bool(jnp.all(jnp.abs(ferr - ferr_ref) <= 0.1 + 0.1 * jnp.abs(ferr_ref)))
    assert bool(jnp.all(jnp.abs(berr - berr_ref) <= 0.1 + 0.1 * jnp.abs(berr_ref)))

    print("KERNEL_OK")
</pallas_src>

<mosaic_0001>
module attributes {stable_mosaic.version = 11 : i64} {
  func.func @icm_kernel(%arg0: i32, %arg1: memref<8x32xf32, #tpu.memory_space<vmem>>, %arg2: memref<8x32xf32, #tpu.memory_space<vmem>>, %arg3: memref<8x8xf32, #tpu.memory_space<vmem>>, %arg4: memref<32x128xbf16, #tpu.memory_space<vmem>>, %arg5: memref<528x256xbf16, #tpu.memory_space<vmem>>, %arg6: memref<8x256xf32, #tpu.memory_space<vmem>>, %arg7: memref<8x2xf32, #tpu.memory_space<vmem>>) attributes {dimension_semantics = [#tpu.dimension_semantics<parallel>], iteration_bounds = array<i64: 1>, scalar_prefetch = 0 : i64, scratch_operands = 0 : i64, tpu.core_type = #tpu.core_type<tc>, window_params = [{transform_indices = @transform_0, window_bounds = array<i64: 8, 32>}, {transform_indices = @transform_1, window_bounds = array<i64: 8, 32>}, {transform_indices = @transform_2, window_bounds = array<i64: 8, 8>}, {pipeline_mode = #tpu.pipeline_mode<synchronous>, transform_indices = @transform_3, window_bounds = array<i64: 32, 128>}, {pipeline_mode = #tpu.pipeline_mode<synchronous>, transform_indices = @transform_4, window_bounds = array<i64: 528, 256>}, {pipeline_mode = #tpu.pipeline_mode<synchronous>, transform_indices = @transform_5, window_bounds = array<i64: 8, 256>}, {transform_indices = @transform_6, window_bounds = array<i64: 8, 2>}]} {
    %c0 = arith.constant 0 : index
    %c0_0 = arith.constant 0 : index
    %0 = vector.load %arg6[%c0, %c0_0] : memref<8x256xf32, #tpu.memory_space<vmem>>, vector<1x128xf32>
    %c1 = arith.constant 1 : index
    %c0_1 = arith.constant 0 : index
    %1 = vector.load %arg6[%c1, %c0_1] : memref<8x256xf32, #tpu.memory_space<vmem>>, vector<1x128xf32>
    %c2 = arith.constant 2 : index
    %c0_2 = arith.constant 0 : index
    %2 = vector.load %arg6[%c2, %c0_2] : memref<8x256xf32, #tpu.memory_space<vmem>>, vector<1x128xf32>
    %c3 = arith.constant 3 : index
    %c0_3 = arith.constant 0 : index
    %3 = vector.load %arg6[%c3, %c0_3] : memref<8x256xf32, #tpu.memory_space<vmem>>, vector<1x256xf32>
    %c4 = arith.constant 4 : index
    %c0_4 = arith.constant 0 : index
    %4 = vector.load %arg6[%c4, %c0_4] : memref<8x256xf32, #tpu.memory_space<vmem>>, vector<1x256xf32>
    %5 = tpu.iota {dimensions = array<i32: 1>} : vector<1x128xi32>
    %c16_i32 = arith.constant 16 : i32
    %6 = vector.broadcast %c16_i32 : i32 to vector<1x128xi32>
    %7 = arith.cmpi slt, %5, %6 : vector<1x128xi32>
    %8 = arith.extui %7 : vector<1x128xi1> to vector<1x128xi32>
    %9 = arith.sitofp %8 : vector<1x128xi32> to vector<1x128xf32>
    %c0_5 = arith.constant 0 : index
    %c0_6 = arith.constant 0 : index
    %10 = vector.load %arg4[%c0_5, %c0_6] : memref<32x128xbf16, #tpu.memory_space<vmem>>, vector<32x128xbf16>
    %c0_7 = arith.constant 0 : index
    %c0_8 = arith.constant 0 : index
    %11 = vector.load %arg1[%c0_7, %c0_8] : memref<8x32xf32, #tpu.memory_space<vmem>>, vector<8x32xf32>
    %12 = arith.truncf %11 : vector<8x32xf32> to vector<8x32xbf16>
    %cst = arith.constant dense<0.000000e+00> : vector<8x128xf32>
    %13 = tpu.matmul %12, %10, %cst {dimension_numbers = #tpu.dot_dimension_numbers<[1], [0], [0], [1], [0, 0, 1, 1], [], []>} : vector<8x32xbf16>, vector<32x128xbf16>, vector<8x128xf32> -> vector<8x128xf32>
    %14 = vector.broadcast %0 : vector<1x128xf32> to vector<8x128xf32>
    %15 = arith.addf %13, %14 : vector<8x128xf32>
    %cst_9 = arith.constant dense<0.000000e+00> : vector<8xf32>
    %16 = vector.multi_reduction <add>, %15, %cst_9 [1] : vector<8x128xf32> to vector<8xf32>
    %17 = vector.shape_cast %16 : vector<8xf32> to vector<8x1xf32>
    %cst_10 = arith.constant 6.250000e-02 : f32
    %18 = vector.broadcast %cst_10 : f32 to vector<8x1xf32>
    %19 = arith.mulf %17, %18 : vector<8x1xf32>
    %20 = vector.broadcast %19 : vector<8x1xf32> to vector<8x128xf32>
    %21 = arith.subf %15, %20 : vector<8x128xf32>
    %22 = arith.mulf %21, %21 : vector<8x128xf32>
    %23 = vector.broadcast %9 : vector<1x128xf32> to vector<8x128xf32>
    %24 = arith.mulf %22, %23 : vector<8x128xf32>
    %cst_11 = arith.constant dense<0.000000e+00> : vector<8xf32>
    %25 = vector.multi_reduction <add>, %24, %cst_11 [1] : vector<8x128xf32> to vector<8xf32>
    %26 = vector.shape_cast %25 : vector<8xf32> to vector<8x1xf32>
    %cst_12 = arith.constant 6.250000e-02 : f32
    %27 = vector.broadcast %cst_12 : f32 to vector<8x1xf32>
    %28 = arith.mulf %26, %27 : vector<8x1xf32>
    %cst_13 = arith.constant 9.99999974E-6 : f32
    %29 = vector.broadcast %cst_13 : f32 to vector<8x1xf32>
    %30 = arith.addf %28, %29 : vector<8x1xf32>
    %31 = math.rsqrt %30 : vector<8x1xf32>
    %32 = vector.broadcast %31 : vector<8x1xf32> to vector<8x128xf32>
    %33 = arith.mulf %21, %32 : vector<8x128xf32>
    %34 = vector.broadcast %1 : vector<1x128xf32> to vector<8x128xf32>
    %35 = arith.mulf %33, %34 : vector<8x128xf32>
    %36 = vector.broadcast %2 : vector<1x128xf32> to vector<8x128xf32>
    %37 = arith.addf %35, %36 : vector<8x128xf32>
    %38 = math.tanh %37 : vector<8x128xf32>
    %c0_14 = arith.constant 0 : index
    %c0_15 = arith.constant 0 : index
    %39 = vector.load %arg2[%c0_14, %c0_15] : memref<8x32xf32, #tpu.memory_space<vmem>>, vector<8x32xf32>
    %40 = arith.truncf %39 : vector<8x32xf32> to vector<8x32xbf16>
    %cst_16 = arith.constant dense<0.000000e+00> : vector<8x128xf32>
    %41 = tpu.matmul %40, %10, %cst_16 {dimension_numbers = #tpu.dot_dimension_numbers<[1], [0], [0], [1], [0, 0, 1, 1], [], []>} : vector<8x32xbf16>, vector<32x128xbf16>, vector<8x128xf32> -> vector<8x128xf32>
    %42 = vector.broadcast %0 : vector<1x128xf32> to vector<8x128xf32>
    %43 = arith.addf %41, %42 : vector<8x128xf32>
    %cst_17 = arith.constant dense<0.000000e+00> : vector<8xf32>
    %44 = vector.multi_reduction <add>, %43, %cst_17 [1] : vector<8x128xf32> to vector<8xf32>
    %45 = vector.shape_cast %44 : vector<8xf32> to vector<8x1xf32>
    %cst_18 = arith.constant 6.250000e-02 : f32
    %46 = vector.broadcast %cst_18 : f32 to vector<8x1xf32>
    %47 = arith.mulf %45, %46 : vector<8x1xf32>
    %48 = vector.broadcast %47 : vector<8x1xf32> to vector<8x128xf32>
    %49 = arith.subf %43, %48 : vector<8x128xf32>
    %50 = arith.mulf %49, %49 : vector<8x128xf32>
    %51 = vector.broadcast %9 : vector<1x128xf32> to vector<8x128xf32>
    %52 = arith.mulf %50, %51 : vector<8x128xf32>
    %cst_19 = arith.constant dense<0.000000e+00> : vector<8xf32>
    %53 = vector.multi_reduction <add>, %52, %cst_19 [1] : vector<8x128xf32> to vector<8xf32>
    %54 = vector.shape_cast %53 : vector<8xf32> to vector<8x1xf32>
    %cst_20 = arith.constant 6.250000e-02 : f32
    %55 = vector.broadcast %cst_20 : f32 to vector<8x1xf32>
    %56 = arith.mulf %54, %55 : vector<8x1xf32>
    %cst_21 = arith.constant 9.99999974E-6 : f32
    %57 = vector.broadcast %cst_21 : f32 to vector<8x1xf32>
    %58 = arith.addf %56, %57 : vector<8x1xf32>
    %59 = math.rsqrt %58 : vector<8x1xf32>
    %60 = vector.broadcast %59 : vector<8x1xf32> to vector<8x128xf32>
    %61 = arith.mulf %49, %60 : vector<8x128xf32>
    %62 = vector.broadcast %1 : vector<1x128xf32> to vector<8x128xf32>
    %63 = arith.mulf %61, %62 : vector<8x128xf32>
    %64 = vector.broadcast %2 : vector<1x128xf32> to vector<8x128xf32>
    %65 = arith.addf %63, %64 : vector<8x128xf32>
    %66 = math.tanh %65 : vector<8x128xf32>
    %c0_22 = arith.constant 0 : index
    %c0_23 = arith.constant 0 : index
    %67 = vector.load %arg3[%c0_22, %c0_23] : memref<8x8xf32, #tpu.memory_space<vmem>>, vector<8x8xf32>
    %cst_24 = arith.constant 0.000000e+00 : f32
    %68 = vector.broadcast %cst_24 : f32 to vector<8x8xf32>
    %69 = tpu.concatenate %67, %68 in 1 : vector<8x8xf32>, vector<8x8xf32> -> vector<8x16xf32>
    %70 = arith.truncf %38 : vector<8x128xf32> to vector<8x128xbf16>
    %71 = arith.truncf %66 : vector<8x128xf32> to vector<8x128xbf16>
    %72 = arith.truncf %69 : vector<8x16xf32> to vector<8x16xbf16>
    %c0_25 = arith.constant 0 : index
    %c0_26 = arith.constant 0 : index
    %73 = vector.load %arg5[%c0_25, %c0_26] : memref<528x256xbf16, #tpu.memory_space<vmem>>, vector<128x256xbf16>
    %cst_27 = arith.constant dense<0.000000e+00> : vector<8x256xf32>
    %74 = tpu.matmul %70, %73, %cst_27 {dimension_numbers = #tpu.dot_dimension_numbers<[1], [0], [0], [1], [0, 0, 1, 1], [], []>} : vector<8x128xbf16>, vector<128x256xbf16>, vector<8x256xf32> -> vector<8x256xf32>
    %c128 = arith.constant 128 : index
    %c0_28 = arith.constant 0 : index
    %75 = vector.load %arg5[%c128, %c0_28] : memref<528x256xbf16, #tpu.memory_space<vmem>>, vector<128x256xbf16>
    %cst_29 = arith.constant dense<0.000000e+00> : vector<8x256xf32>
    %76 = tpu.matmul %71, %75, %cst_29 {dimension_numbers = #tpu.dot_dimension_numbers<[1], [0], [0], [1], [0, 0, 1, 1], [], []>} : vector<8x128xbf16>, vector<128x256xbf16>, vector<8x256xf32> -> vector<8x256xf32>
    %77 = arith.addf %74, %76 : vector<8x256xf32>
    %c256 = arith.constant 256 : index
    %c0_30 = arith.constant 0 : index
    %78 = vector.load %arg5[%c256, %c0_30] : memref<528x256xbf16, #tpu.memory_space<vmem>>, vector<16x256xbf16>
    %cst_31 = arith.constant dense<0.000000e+00> : vector<8x256xf32>
    %79 = tpu.matmul %72, %78, %cst_31 {dimension_numbers = #tpu.dot_dimension_numbers<[1], [0], [0], [1], [0, 0, 1, 1], [], []>} : vector<8x16xbf16>, vector<16x256xbf16>, vector<8x256xf32> -> vector<8x256xf32>
    %80 = arith.addf %77, %79 : vector<8x256xf32>
    %81 = vector.broadcast %3 : vector<1x256xf32> to vector<8x256xf32>
    %82 = arith.addf %80, %81 : vector<8x256xf32>
    %cst_32 = arith.constant 0.000000e+00 : f32
    %83 = vector.broadcast %cst_32 : f32 to vector<8x256xf32>
    %84 = arith.maximumf %82, %83 : vector<8x256xf32>
    %85 = arith.truncf %84 : vector<8x256xf32> to vector<8x256xbf16>
    %c272 = arith.constant 272 : index
    %c0_33 = arith.constant 0 : index
    %86 = vector.load %arg5[%c272, %c0_33] : memref<528x256xbf16, #tpu.memory_space<vmem>>, vector<256x256xbf16>
    %cst_34 = arith.constant dense<0.000000e+00> : vector<8x256xf32>
    %87 = tpu.matmul %85, %86, %cst_34 {dimension_numbers = #tpu.dot_dimension_numbers<[1], [0], [0], [1], [0, 0, 1, 1], [], []>} : vector<8x256xbf16>, vector<256x256xbf16>, vector<8x256xf32> -> vector<8x256xf32>
    %88 = vector.broadcast %4 : vector<1x256xf32> to vector<8x256xf32>
    %89 = arith.addf %87, %88 : vector<8x256xf32>
    %90 = vector.extract_strided_slice %89 {offsets = [0, 0], sizes = [8, 128], strides = [1, 1]} : vector<8x256xf32> to vector<8x128xf32>
    %91 = vector.extract_strided_slice %89 {offsets = [0, 128], sizes = [8, 128], strides = [1, 1]} : vector<8x256xf32> to vector<8x128xf32>
    %92 = math.tanh %91 : vector<8x128xf32>
    %93 = arith.subf %66, %90 : vector<8x128xf32>
    %94 = vector.extract_strided_slice %92 {offsets = [0, 0], sizes = [8, 16], strides = [1, 1]} : vector<8x128xf32> to vector<8x16xf32>
    %95 = arith.subf %69, %94 : vector<8x16xf32>
    %96 = arith.mulf %93, %93 : vector<8x128xf32>
    %cst_35 = arith.constant dense<0.000000e+00> : vector<8xf32>
    %97 = vector.multi_reduction <add>, %96, %cst_35 [1] : vector<8x128xf32> to vector<8xf32>
    %98 = vector.shape_cast %97 : vector<8xf32> to vector<8x1xf32>
    %99 = math.sqrt %98 : vector<8x1xf32>
    %100 = arith.mulf %95, %95 : vector<8x16xf32>
    %cst_36 = arith.constant dense<0.000000e+00> : vector<8xf32>
    %101 = vector.multi_reduction <add>, %100, %cst_36 [1] : vector<8x16xf32> to vector<8xf32>
    %102 = vector.shape_cast %101 : vector<8xf32> to vector<8x1xf32>
    %103 = math.sqrt %102 : vector<8x1xf32>
    %104 = tpu.iota {dimensions = array<i32: 1>} : vector<8x2xi32>
    %c0_i32 = arith.constant 0 : i32
    %105 = vector.broadcast %c0_i32 : i32 to vector<8x2xi32>
    %106 = arith.cmpi eq, %104, %105 : vector<8x2xi32>
    %107 = vector.shape_cast %99 : vector<8x1xf32> to vector<8x1xf32>
    %108 = vector.broadcast %107 : vector<8x1xf32> to vector<8x2xf32>
    %109 = vector.shape_cast %103 : vector<8x1xf32> to vector<8x1xf32>
    %110 = vector.broadcast %109 : vector<8x1xf32> to vector<8x2xf32>
    %111 = arith.select %106, %108, %110 : vector<8x2xi1>, vector<8x2xf32>
    %c0_37 = arith.constant 0 : index
    %c0_38 = arith.constant 0 : index
    %112 = vector.load %arg7[%c0_37, %c0_38] : memref<8x2xf32, #tpu.memory_space<vmem>>, vector<8x2xf32>
    tpu.vector_store %arg7[%c0_37, %c0_38], %111 {strides = array<i32>} : memref<8x2xf32, #tpu.memory_space<vmem>>, vector<8x2xf32>,
    return
  }
  func.func @transform_0(%arg0: i32) -> (i32, i32) {
    %c0_i32 = arith.constant 0 : i32
    %c0_i32_0 = arith.constant 0 : i32
    return %arg0, %c0_i32 : i32, i32
  }
  func.func @transform_1(%arg0: i32) -> (i32, i32) {
    %c0_i32 = arith.constant 0 : i32
    %c0_i32_0 = arith.constant 0 : i32
    return %arg0, %c0_i32 : i32, i32
  }
  func.func @transform_2(%arg0: i32) -> (i32, i32) {
    %c0_i32 = arith.constant 0 : i32
    %c0_i32_0 = arith.constant 0 : i32
    return %arg0, %c0_i32 : i32, i32
  }
  func.func @transform_3(%arg0: i32) -> (i32, i32) {
    %c0_i32 = arith.constant 0 : i32
    %c0_i32_0 = arith.constant 0 : i32
    %c0_i32_1 = arith.constant 0 : i32
    return %c0_i32, %c0_i32_0 : i32, i32
  }
  func.func @transform_4(%arg0: i32) -> (i32, i32) {
    %c0_i32 = arith.constant 0 : i32
    %c0_i32_0 = arith.constant 0 : i32
    %c0_i32_1 = arith.constant 0 : i32
    return %c0_i32, %c0_i32_0 : i32, i32
  }
  func.func @transform_5(%arg0: i32) -> (i32, i32) {
    %c0_i32 = arith.constant 0 : i32
    %c0_i32_0 = arith.constant 0 : i32
    %c0_i32_1 = arith.constant 0 : i32
    return %c0_i32, %c0_i32_0 : i32, i32
  }
  func.func @transform_6(%arg0: i32) -> (i32, i32) {
    %c0_i32 = arith.constant 0 : i32
    %c0_i32_0 = arith.constant 0 : i32
    return %arg0, %c0_i32 : i32, i32
  }
}

</mosaic_0001>

<bundles_post_ra>
// kernel: tpu_custom_call.1
= control target key start
LH: loop header
LB: loop body
LE: loop exit
PB: predicated region body
PF: predicated region fallthrough
CT: control target
= control target key end

     0   :  { %11 = vsyncpa [#allocation3], 0  ;;  %s1439_s0 = inlined_call_operand.hbm [shape: f32[8,32], index: 0, kind: input, shape index: {}]   ;;  %s1440_s1 = inlined_call_operand.hbm [shape: f32[8,32], index: 1, kind: input, shape index: {}]   ;;  %s1441_s2 = inlined_call_operand.hbm [shape: f32[8,8], index: 2, kind: input, shape index: {}]   ;;  %s1442_s3 = inlined_call_operand.hbm [shape: bf16[32,128], index: 3, kind: input, shape index: {}]   ;;  %s1443_s4 = inlined_call_operand.hbm [shape: bf16[528,256], index: 4, kind: input, shape index: {}]   ;;  %s1444_s5 = inlined_call_operand.hbm [shape: f32[8,256], index: 5, kind: input, shape index: {}]   ;;  %s1445_s6 = inlined_call_operand.vmem [shape: f32[8,2], index: 6, kind: output, shape index: {}]  }
   0x1   :  { %12 = vsyncpa [#allocation5], 0 }
   0x2   :  { %13 = vsyncpa [#allocation8], 0  ;;  %s31_s23 = sshll.u32 %s1440_s1, 4  ;;  %s32_s23 = int_to_ptr.hbm [resolvable:$true] %s31_s23 }
   0x3   :  { %14 = vsyncpa [#allocation11], 0  ;;  %s1345_s24 = smov [#allocation4]   ;;  %s52_s28 = sshll.u32 %s1442_s3, 4  ;;  %s53_s28 = int_to_ptr.hbm [resolvable:$true] %s52_s28 }
   0x4   :  { %s33_s25 = sshll.u32 %s1345_s24, 4  ;;  %s1346_s29 = smov [#allocation7]   ;;  %s34_s25 = int_to_ptr.vmem [resolvable:$true] %s33_s25 }
   0x5   :  { %36 = dma.hbm_to_vmem [thread:$0]  %s32_s23, 128, %s34_s25, [#allocation5]  }
   0x6   :  { %s54_s30 = sshll.u32 %s1346_s29, 4  ;;  %s1347_s7 = smov 64   ;;  %s55_s30 = int_to_ptr.vmem [resolvable:$true] %s54_s30 }
   0x7   :  { %s1348_s8 = smov 4   ;;  %s20_s1 = sshll.u32 %s1439_s0, 4  ;;  %s21_s1 = int_to_ptr.hbm [resolvable:$true] %s20_s1 }
   0x8   :  { %60 = dma.hbm_to_vmem [thread:$0]  %s53_s28, 256, %s55_s30, [#allocation8], %s1347_s7, %s1347_s7, %s1348_s8  }
   0x9   :  { %s1349_s11 = smov [#allocation2]   ;;  %s42_s3 = sshll.u32 %s1441_s2, 4  ;;  %s43_s3 = int_to_ptr.hbm [resolvable:$true] %s42_s3 }
   0xa   :  { %s22_s12 = sshll.u32 %s1349_s11, 4  ;;  %s1350_s15 = smov [#allocation6]   ;;  %s23_s12 = int_to_ptr.vmem [resolvable:$true] %s22_s12 }
   0xb   :  { %25 = dma.hbm_to_vmem [thread:$0]  %s21_s1, 128, %s23_s12, [#allocation3]  }
   0xc   :  { %s44_s16 = sshll.u32 %s1350_s15, 4  ;;  %s65_s19 = sshll.u32 %s1443_s4, 4  ;;  %s45_s16 = int_to_ptr.vmem [resolvable:$true] %s44_s16  ;;  %s66_s19 = int_to_ptr.hbm [resolvable:$true] %s65_s19 }
   0xd   :  { %47 = dma.hbm_to_vmem [thread:$0]  %s43_s3, 128, %s45_s16, [#allocation5]  }
   0xe   :  { %s1351_s0 = smov [#allocation9]   ;;  %s79_s23 = sshll.u32 %s1444_s5, 4  ;;  %s80_s23 = int_to_ptr.hbm [resolvable:$true] %s79_s23 }
   0xf   :  { %s67_s20 = sshll.u32 %s1351_s0, 4  ;;  %s1352_s24 = smov 128   ;;  %s68_s20 = int_to_ptr.vmem [resolvable:$true] %s67_s20 }
  0x10   :  { %s1353_s2 = smov 8   ;;  %s1354_s25 = smov [#allocation10]  }
  0x11   :  { %73 = dma.hbm_to_vmem [thread:$0]  %s66_s19, 8448, %s68_s20, [#allocation8], %s1352_s24, %s1352_s24, %s1353_s2  }
  0x12   :  { %s81_s26 = sshll.u32 %s1354_s25, 4  ;;  %s82_s26 = int_to_ptr.vmem [resolvable:$true] %s81_s26 }
  0x13   :  { %84 = dma.hbm_to_vmem [thread:$0]  %s80_s23, 256, %s82_s26, [#allocation11]  }
  0x14   :  { %1337 = dma.done.wait [#allocation3], 128  }
  0x15   :  { %1338 = vsyncadd [#allocation3], 4294967168 }
  0x16   :  { %1339 = dma.done.wait [#allocation5], 256  }
  0x17   :  { %1340 = vsyncadd [#allocation5], 4294967040 }
  0x18   :  { %1341 = dma.done.wait [#allocation8], 8704  }
  0x19   :  { %1342 = vsyncadd [#allocation8], 4294958592 }
  0x1a   :  { %1343 = dma.done.wait [#allocation11], 256  }
  0x1b   :  { %1344 = vsyncadd [#allocation11], 4294967040  ;;  %v1101_v0 = vld [vmem:[#allocation7 + $0x8] sm:$0xff]  ;;  %v1100_v1 = vld [vmem:[#allocation7] sm:$0xff]  ;;  %vm140_vm0 = vcmask 261120   ;;  %v117_v13 = vlaneseq  ;;  %v1355_v18 = vmov 0.0  }
  0x1c   :  { %192 = vmatpush.bf16.msra.mxu1 %v1101_v0  ;;  %v181_v2 = vld [vmem:[#allocation4] sm:$0xff]  ;;  %150 = vmatpush.bf16.msra.mxu0 %v1101_v0  ;;  %v126_v3 = vld [vmem:[#allocation2] sm:$0xff]  ;;  %v110_v6 = vld [vmem:[#allocation10] ss:$0 sm:$0xff]  ;;  %vm224_vm8 = vcmask 64512   ;;  %vm485_vm9 = vcmask 130048  }
  0x1d   :  { %v182_v4 = vpack.c.bf16 %v181_v2, %v181_v2  ;;  %v127_v5 = vpack.c.bf16 %v126_v3, %v126_v3  ;;  %v1409_v14 = vand.u32 127, %v117_v13  ;;  %v892_v27 = vld [vmem:[#allocation9 + $0xf0] sm:$0xf]  ;;  %v1133_v28 = vld [vmem:[#allocation9 + $0xf4] sm:$0xf0]  ;;  %vm813_vm14 = vcmask 15360  }
  0x1e   :  { %v1132_v29 = vld [vmem:[#allocation9 + $0xf4] sm:$0xf]  ;;  %v893_v30 = vor.u32 %v1133_v28, %v892_v27  ;;  %v894_v31 = vld [vmem:[#allocation9 + $0xf8] sm:$0xf0]  ;;  %v884_v33 = vld [vmem:[#allocation9 + $0xe0] sm:$0xf] }
  0x1f   :  { %vm119_vm1 = vcmp.lt.s32.totalorder %v1409_v14, 16  ;;  %v897_v32 = vor.u32 %v1132_v29, %v894_v31  ;;  %v1131_v34 = vld [vmem:[#allocation9 + $0xe4] sm:$0xf0]  ;;  %v1130_v35 = vld [vmem:[#allocation9 + $0xe4] sm:$0xf]  ;;  %vm811_vm11 = vcmp.eq.s32.totalorder %v1409_v14, 0 }
  0x20   :  { %193 = vmatpush.bf16.msra.mxu1 %v1100_v1  ;;  %151 = vmatpush.bf16.msra.mxu0 %v1100_v1  ;;  %v823_v19 = vsel %vm119_vm1, 1.0, %v1355_v18  ;;  %v885_v36 = vor.u32 %v1131_v34, %v884_v33  ;;  %v886_v37 = vld [vmem:[#allocation9 + $0xe8] sm:$0xf0]  ;;  %v876_v39 = vld [vmem:[#allocation9 + $0xd0] sm:$0xf] }
  0x21   :  { %341 = vmatpush.bf16.msra.mxu2 %v893_v30  ;;  %354 = vmatpush.bf16.msra.mxu3 %v897_v32  ;;  %v889_v38 = vor.u32 %v1130_v35, %v886_v37  ;;  %v1129_v40 = vld [vmem:[#allocation9 + $0xd4] sm:$0xf0]  ;;  %v1128_v41 = vld [vmem:[#allocation9 + $0xd4] sm:$0xf]  ;;  %v878_v43 = vld [vmem:[#allocation9 + $0xd8] sm:$0xf0] }
  0x22   :  { %v877_v42 = vor.u32 %v1129_v40, %v876_v39  ;;  %v956_v44 = vld [vmem:[#allocation9 + $0x70] sm:$0xf]  ;;  %v1117_v45 = vld [vmem:[#allocation9 + $0x74] sm:$0xf0]  ;;  %v881_v46 = vor.u32 %v1128_v41, %v878_v43  ;;  %v1116_v48 = vld [vmem:[#allocation9 + $0x74] sm:$0xf] }
  0x23   :  { %833 = vmatmul.msk.bf16.vlgmr.msra.gmra.mxu1 %vm140_vm0, %v182_v4  ;;  %832 = vmatmul.msk.bf16.vlgmr.msra.gmra.mxu0 %vm140_vm0, %v127_v5  ;;  %v957_v47 = vor.u32 %v1117_v45, %v956_v44  ;;  %v958_v49 = vld [vmem:[#allocation9 + $0x78] sm:$0xf0]  ;;  %v868_v51 = vld [vmem:[#allocation9 + $0xc0] sm:$0xf]  ;;  %v1127_v52 = vld [vmem:[#allocation9 + $0xc4] sm:$0xf0] }
  0x24   :  { %v961_v50 = vor.u32 %v1116_v48, %v958_v49  ;;  %v1126_v53 = vld [vmem:[#allocation9 + $0xc4] sm:$0xf]  ;;  %v869_v54 = vor.u32 %v1127_v52, %v868_v51  ;;  %v870_v55 = vld [vmem:[#allocation9 + $0xc8] sm:$0xf0]  ;;  %v948_v56 = vld [vmem:[#allocation9 + $0x60] sm:$0xf] }
  0x25   :  { %342 = vmatpush.bf16.msra.mxu2 %v885_v36  ;;  %355 = vmatpush.bf16.msra.mxu3 %v889_v38  ;;  %v1115_v57 = vld [vmem:[#allocation9 + $0x64] sm:$0xf0]  ;;  %v873_v58 = vor.u32 %v1126_v53, %v870_v55  ;;  %v1114_v60 = vld [vmem:[#allocation9 + $0x64] sm:$0xf]  ;;  %v950_v61 = vld [vmem:[#allocation9 + $0x68] sm:$0xf0] }
  0x26   :  { %447 = vmatpush.bf16.msrb.mxu0 %v957_v47  ;;  %460 = vmatpush.bf16.msrb.mxu1 %v961_v50  ;;  %v949_v59 = vor.u32 %v1115_v57, %v948_v56  ;;  %v953_v62 = vor.u32 %v1114_v60, %v950_v61  ;;  %v860_v63 = vld [vmem:[#allocation9 + $0xb0] sm:$0xf]  ;;  %v1125_v0 = vld [vmem:[#allocation9 + $0xb4] sm:$0xf0]  ;;  %v1124_v1 = vld [vmem:[#allocation9 + $0xb4] sm:$0xf] }
  0x27   :  { %v861_v2 = vor.u32 %v1125_v0, %v860_v63  ;;  %v862_v3 = vld [vmem:[#allocation9 + $0xb8] sm:$0xf0]  ;;  %v940_v4 = vld [vmem:[#allocation9 + $0x50] sm:$0xf]  ;;  %v1113_v5 = vld [vmem:[#allocation9 + $0x54] sm:$0xf0] }
  0x28   :  { %v1122_v13 = vld [vmem:[#allocation9 + $0xa4] sm:$0xf]  ;;  %v932_v18 = vld [vmem:[#allocation9 + $0x40] sm:$0xf]  ;;  %v1121_v27 = vld [vmem:[#allocation9 + $0x94] sm:$0xf0] }
  0x29   :  { %343 = vmatpush.bf16.msra.mxu2 %v877_v42  ;;  %356 = vmatpush.bf16.msra.mxu3 %v881_v46  ;;  %v1120_v28 = vld [vmem:[#allocation9 + $0x94] sm:$0xf]  ;;  %v846_v30 = vld [vmem:[#allocation9 + $0x98] sm:$0xf0]  ;;  %v924_v31 = vld [vmem:[#allocation9 + $0x30] sm:$0xf] }
  0x2a   :  { %448 = vmatpush.bf16.msrb.mxu0 %v949_v59  ;;  %461 = vmatpush.bf16.msrb.mxu1 %v953_v62  ;;  %v1109_v32 = vld [vmem:[#allocation9 + $0x34] sm:$0xf0]  ;;  %v849_v33 = vor.u32 %v1120_v28, %v846_v30  ;;  %v1108_v35 = vld [vmem:[#allocation9 + $0x34] sm:$0xf]  ;;  %v926_v36 = vld [vmem:[#allocation9 + $0x38] sm:$0xf0] }
  0x2b   :  { %v925_v34 = vor.u32 %v1109_v32, %v924_v31  ;;  %v929_v37 = vor.u32 %v1108_v35, %v926_v36  ;;  %v836_v38 = vld [vmem:[#allocation9 + $0x80] sm:$0xf]  ;;  %v1119_v39 = vld [vmem:[#allocation9 + $0x84] sm:$0xf0]  ;;  %v1118_v40 = vld [vmem:[#allocation9 + $0x84] sm:$0xf] }
  0x2c   :  { %v837_v42 = vor.u32 %v1119_v39, %v836_v38  ;;  %v838_v43 = vld [vmem:[#allocation9 + $0x88] sm:$0xf0]  ;;  %v916_v44 = vld [vmem:[#allocation9 + $0x20] sm:$0xf]  ;;  %v1107_v45 = vld [vmem:[#allocation9 + $0x24] sm:$0xf0] }
  0x2d   :  { %344 = vmatpush.bf16.msra.mxu2 %v869_v54  ;;  %357 = vmatpush.bf16.msra.mxu3 %v873_v58  ;;  %v841_v47 = vor.u32 %v1118_v40, %v838_v43  ;;  %v917_v48 = vor.u32 %v1107_v45, %v916_v44  ;;  %v1106_v49 = vld [vmem:[#allocation9 + $0x24] sm:$0xf]  ;;  %v918_v50 = vld [vmem:[#allocation9 + $0x28] sm:$0xf0]  ;;  %v908_v53 = vld [vmem:[#allocation9 + $0x10] sm:$0xf] }
  0x2e   :  { %v921_v51 = vor.u32 %v1106_v49, %v918_v50  ;;  %v1105_v54 = vld [vmem:[#allocation9 + $0x14] sm:$0xf0]  ;;  %v1104_v55 = vld [vmem:[#allocation9 + $0x14] sm:$0xf]  ;;  %v910_v57 = vld [vmem:[#allocation9 + $0x18] sm:$0xf0] }
  0x2f   :  { %v909_v56 = vor.u32 %v1105_v54, %v908_v53  ;;  %v964_v58 = vld [vmem:[#allocation9 + $0x100] sm:$0xf]  ;;  %v1135_v59 = vld [vmem:[#allocation9 + $0x104] sm:$0xf0]  ;;  %v913_v60 = vor.u32 %v1104_v55, %v910_v57  ;;  %v1134_v61 = vld [vmem:[#allocation9 + $0x104] sm:$0xf] }
  0x30   :  { %v965_v62 = vor.u32 %v1135_v59, %v964_v58  ;;  %v966_v63 = vld [vmem:[#allocation9 + $0x108] sm:$0xf0]  ;;  %v900_v0 = vld [vmem:[#allocation9] sm:$0xf]  ;;  %v112_v31 = vld [vmem:[#allocation10 + $0x2] ss:$0 sm:$0xff] }
  0x31   :  { %345 = vmatpush.bf16.msra.mxu2 %v861_v2  ;;  %v1149_v35 = vld [vmem:[#allocation9 + $0x174] sm:$0xf0]  ;;  %v1086_v36 = vld [vmem:[#allocation9 + $0x1f0] sm:$0xf]  ;;  %v1150_v44 = vld [vmem:[#allocation9 + $0x184] sm:$0xf] }
  0x32   :  { %v1165_v39 = vld [vmem:[#allocation9 + $0x1f4] sm:$0xf0]  ;;  %v1032_v45 = vld [vmem:[#allocation9 + $0x188] sm:$0xf0]  ;;  %v1148_v53 = vld [vmem:[#allocation9 + $0x174] sm:$0xf] }
  0x33   :  { %v1024_v55 = vld [vmem:[#allocation9 + $0x178] sm:$0xf0] }
  0x34   :  { %v1088_v57 = vld [vmem:[#allocation9 + $0x1f8] sm:$0xf0] }
  0xa0   :  { %v195_v7 = vpop.f32.mrf.mxu1  ;;  %v153_v8 = vpop.f32.mrf.mxu0 }
  0xa1   :  { %v196_v9 = vadd.f32 %v195_v7, %v110_v6  ;;  %v154_v10 = vadd.f32 %v153_v8, %v110_v6  ;;  %v865_v6 = vor.u32 %v1124_v1, %v862_v3  ;;  %v941_v7 = vor.u32 %v1113_v5, %v940_v4  ;;  %v1112_v8 = vld [vmem:[#allocation9 + $0x54] sm:$0xf]  ;;  %v1103_v1 = vld [vmem:[#allocation9 + $0x4] sm:$0xf0]  ;;  %v1102_v5 = vld [vmem:[#allocation9 + $0x4] sm:$0xf] }
  0xa2   :  { %v969_v3 = vor.u32 %v1134_v61, %v966_v63  ;;  %v901_v4 = vor.u32 %v1103_v1, %v900_v0  ;;  %v223_v61 = vld [vmem:[#allocation6] sm:$0xff]  ;;  %v1014_v0 = vld [vmem:[#allocation9 + $0x160] sm:$0xf] }
  0xa3   :  { %199 = vadd.xlane.f32.xlu0 %v196_v9  ;;  %358 = vmatpush.bf16.msra.mxu3 %v865_v6  ;;  %v902_v6 = vld [vmem:[#allocation9 + $0x8] sm:$0xf0]  ;;  %v1147_v1 = vld [vmem:[#allocation9 + $0x164] sm:$0xf0] }
  0xa4   :  { %449 = vmatpush.bf16.msrb.mxu0 %v941_v7 }
  0xa8   :  { %v197_v11 = vpop.f32.mrf.mxu1  ;;  %v155_v12 = vpop.f32.mrf.mxu0 }
  0xa9   :  { %v852_v11 = vld [vmem:[#allocation9 + $0xa0] sm:$0xf]  ;;  %v1123_v12 = vld [vmem:[#allocation9 + $0xa4] sm:$0xf0] }
  0xab   :  { %157 = vadd.xlane.f32.xlu0 %v154_v10 }
 0x116   :  { %v200_v15 = vpop.xlane.xlu0 %199 }
 0x117   :  { %v201_v16 = vmul.f32 0.0625, %v200_v15  ;;  %v853_v15 = vor.u32 %v1123_v12, %v852_v11 }
 0x119   :  { %v1412_v17 = vsub.f32 %v196_v9, %v201_v16  ;;  %v942_v9 = vld [vmem:[#allocation9 + $0x58] sm:$0xf0]  ;;  %v854_v16 = vld [vmem:[#allocation9 + $0xa8] sm:$0xf0]  ;;  %346 = vmatpush.bf16.msra.mxu2 %v853_v15 }
 0x11b   :  { %v203_v20 = vmul.f32 %v1412_v17, %v1412_v17 }
 0x11d   :  { %v204_v21 = vmul.f32 %v823_v19, %v203_v20  ;;  %v857_v20 = vor.u32 %v1122_v13, %v854_v16 }
 0x11e   :  { %v158_v22 = vpop.xlane.xlu0 %157 }
 0x11f   :  { %v159_v23 = vmul.f32 0.0625, %v158_v22  ;;  %205 = vadd.xlane.f32.xlu1 %v204_v21  ;;  %v1110_v22 = vld [vmem:[#allocation9 + $0x44] sm:$0xf]  ;;  %359 = vmatpush.bf16.msra.mxu3 %v857_v20  ;;  %v111_v20 = vld [vmem:[#allocation10 + $0x1] ss:$0 sm:$0xff] }
 0x121   :  { %v1416_v24 = vsub.f32 %v154_v10, %v159_v23  ;;  %v945_v10 = vor.u32 %v1112_v8, %v942_v9  ;;  %v934_v23 = vld [vmem:[#allocation9 + $0x48] sm:$0xf0]  ;;  %v905_v8 = vor.u32 %v1102_v5, %v902_v6  ;;  %v1146_v5 = vld [vmem:[#allocation9 + $0x164] sm:$0xf] }
 0x122   :  { %v1016_v6 = vld [vmem:[#allocation9 + $0x168] sm:$0xf0] }
 0x123   :  { %v161_v25 = vmul.f32 %v1416_v24, %v1416_v24  ;;  %462 = vmatpush.bf16.msrb.mxu1 %v945_v10  ;;  %360 = vmatpush.bf16.msra.mxu3 %v849_v33 }
 0x125   :  { %v162_v26 = vmul.f32 %v823_v19, %v161_v25  ;;  %v1111_v19 = vld [vmem:[#allocation9 + $0x44] sm:$0xf0]  ;;  %v937_v25 = vor.u32 %v1110_v22, %v934_v23  ;;  %v1030_v23 = vld [vmem:[#allocation9 + $0x180] sm:$0xf] }
 0x126   :  { %v933_v21 = vor.u32 %v1111_v19, %v932_v18 }
 0x127   :  { %163 = vadd.xlane.f32.xlu1 %v162_v26  ;;  %v844_v26 = vld [vmem:[#allocation9 + $0x90] sm:$0xf]  ;;  %463 = vmatpush.bf16.msrb.mxu1 %v937_v25  ;;  %v1151_v25 = vld [vmem:[#allocation9 + $0x184] sm:$0xf0] }
 0x128   :  { %450 = vmatpush.bf16.msrb.mxu0 %v933_v21  ;;  %v845_v29 = vor.u32 %v1121_v27, %v844_v26  ;;  %361 = vmatpush.bf16.msra.mxu3 %v841_v47  ;;  %v1094_v26 = vld [vmem:[#allocation9 + $0x200] sm:$0xf]  ;;  %v1031_v28 = vor.u32 %v1151_v25, %v1030_v23  ;;  %v1096_v47 = vld [vmem:[#allocation9 + $0x208] sm:$0xf0]  ;;  %v1160_v23 = vld [vmem:[#allocation9 + $0x1d4] sm:$0xf] }
 0x129   :  { %v1072_v25 = vld [vmem:[#allocation9 + $0x1d8] sm:$0xf0] }
 0x12a   :  { %347 = vmatpush.bf16.msra.mxu2 %v845_v29  ;;  %v1167_v29 = vld [vmem:[#allocation9 + $0x204] sm:$0xf0] }
 0x12b   :  { %464 = vmatpush.bf16.msrb.mxu1 %v929_v37  ;;  %v1095_v32 = vor.u32 %v1167_v29, %v1094_v26  ;;  %v1075_v26 = vor.u32 %v1160_v23, %v1072_v25  ;;  %v1062_v29 = vld [vmem:[#allocation9 + $0x1c0] sm:$0xf] }
 0x12c   :  { %451 = vmatpush.bf16.msrb.mxu0 %v925_v34  ;;  %509 = vmatpush.bf16.msrb.mxu3 %v969_v3  ;;  %v1022_v34 = vld [vmem:[#allocation9 + $0x170] sm:$0xf]  ;;  %v1015_v3 = vor.u32 %v1147_v1, %v1014_v0  ;;  %v1137_v0 = vld [vmem:[#allocation9 + $0x114] sm:$0xf0] }
 0x12d   :  { %v1023_v38 = vor.u32 %v1149_v35, %v1022_v34  ;;  %v1038_v1 = vld [vmem:[#allocation9 + $0x190] sm:$0xf] }
 0x12e   :  { %348 = vmatpush.bf16.msra.mxu2 %v837_v42 }
 0x12f   :  { %465 = vmatpush.bf16.msrb.mxu1 %v921_v51  ;;  %v1035_v51 = vor.u32 %v1150_v44, %v1032_v45  ;;  %v992_v44 = vld [vmem:[#allocation9 + $0x138] sm:$0xf0] }
 0x130   :  { %452 = vmatpush.bf16.msrb.mxu0 %v917_v48 }
 0x132   :  { %496 = vmatpush.bf16.msrb.mxu2 %v965_v62  ;;  %v1426_v62 = vsel %vm224_vm8, %v223_v61, 0.0 }
 0x133   :  { %466 = vmatpush.bf16.msrb.mxu1 %v913_v60  ;;  %v228_v63 = vpack.c.bf16 %v1426_v62, %v1426_v62 }
 0x134   :  { %453 = vmatpush.bf16.msrb.mxu0 %v909_v56  ;;  %v1164_v56 = vld [vmem:[#allocation9 + $0x1f4] sm:$0xf] }
 0x135   :  { %v1091_v58 = vor.u32 %v1164_v56, %v1088_v57  ;;  %v1138_v56 = vld [vmem:[#allocation9 + $0x124] sm:$0xf]  ;;  %v984_v57 = vld [vmem:[#allocation9 + $0x128] sm:$0xf0] }
 0x137   :  { %467 = vmatpush.bf16.msrb.mxu1 %v905_v8  ;;  %v1019_v8 = vor.u32 %v1146_v5, %v1016_v6  ;;  %v976_v5 = vld [vmem:[#allocation9 + $0x118] sm:$0xf0] }
 0x138   :  { %454 = vmatpush.bf16.msrb.mxu0 %v901_v4  ;;  %v1163_v4 = vld [vmem:[#allocation9 + $0x1e4] sm:$0xf0] }
 0x13b   :  { %738 = vmatpush.bf16.msra.mxu1 %v1095_v32  ;;  %v1142_v32 = vld [vmem:[#allocation9 + $0x144] sm:$0xf] }
 0x13c   :  { %725 = vmatpush.bf16.msra.mxu0 %v1031_v28  ;;  %v1143_v28 = vld [vmem:[#allocation9 + $0x144] sm:$0xf0] }
 0x140   :  { %726 = vmatpush.bf16.msra.mxu0 %v1023_v38 }
 0x144   :  { %727 = vmatpush.bf16.msra.mxu0 %v1015_v3  ;;  %v1153_v3 = vld [vmem:[#allocation9 + $0x194] sm:$0xf0] }
 0x145   :  { %v1039_v6 = vor.u32 %v1153_v3, %v1038_v1 }
 0x192   :  { %v206_v41 = vpop.xlane.xlu1 %205 }
 0x193   :  { %v207_v46 = vmul.f32 0.0625, %v206_v41  ;;  %v1087_v41 = vor.u32 %v1165_v39, %v1086_v36  ;;  %v1158_v36 = vld [vmem:[#allocation9 + $0x1c4] sm:$0xf]  ;;  %v990_v39 = vld [vmem:[#allocation9 + $0x130] sm:$0xf] }
 0x195   :  { %v208_v52 = vadd.f32 1e-05, %v207_v46  ;;  %739 = vmatpush.bf16.msra.mxu1 %v1087_v41  ;;  %v1166_v46 = vld [vmem:[#allocation9 + $0x204] sm:$0xf]  ;;  %v1054_v41 = vld [vmem:[#allocation9 + $0x1b0] sm:$0xf] }
 0x197   :  { %1179 = vrsqrt.f32 %v208_v52  ;;  %vm215_vm3 = vweird.f32 %v208_v52 }
 0x19a   :  { %v164_v2 = vpop.xlane.xlu1 %163 }
 0x19b   :  { %v165_v7 = vmul.f32 0.0625, %v164_v2  ;;  %v1078_v2 = vld [vmem:[#allocation9 + $0x1e0] sm:$0xf] }
 0x19d   :  { %v1180_v9 = vpop.eup %1179  ;;  %v166_v10 = vadd.f32 1e-05, %v165_v7  ;;  %v1079_v7 = vor.u32 %v1163_v4, %v1078_v2  ;;  %v1136_v4 = vld [vmem:[#allocation9 + $0x114] sm:$0xf] }
 0x19e   :  { %v210_v11 = vmul.f32 %v1180_v9, %v208_v52  ;;  %vm216_vm2 = vweird.f32 %v1180_v9  ;;  %v1099_v52 = vor.u32 %v1166_v46, %v1096_v47  ;;  %v1156_v47 = vld [vmem:[#allocation9 + $0x1b4] sm:$0xf] }
 0x19f   :  { %1181 = vrsqrt.f32 %v166_v10  ;;  %vm217_vm4 = vmor %vm215_vm3, %vm216_vm2  ;;  %vm173_vm6 = vweird.f32 %v166_v10  ;;  %740 = vmatpush.bf16.msra.mxu1 %v1079_v7  ;;  %v979_v7 = vor.u32 %v1136_v4, %v976_v5 }
 0x1a0   :  { %v211_v12 = vmul.f32 %v1180_v9, %v210_v11 }
 0x1a2   :  { %v212_v13 = vmul.f32 0.5, %v211_v12  ;;  %v1006_v12 = vld [vmem:[#allocation9 + $0x150] sm:$0xf] }
 0x1a4   :  { %v213_v15 = vsub.f32 1.5, %v212_v13  ;;  %v1145_v13 = vld [vmem:[#allocation9 + $0x154] sm:$0xf0] }
 0x1a5   :  { %v1182_v16 = vpop.eup %1181 }
 0x1a6   :  { %v214_v18 = vmul.f32 %v1180_v9, %v213_v15  ;;  %v168_v19 = vmul.f32 %v1182_v16, %v166_v10  ;;  %vm174_vm5 = vweird.f32 %v1182_v16  ;;  %v1080_v10 = vld [vmem:[#allocation9 + $0x1e8] sm:$0xf0]  ;;  %v1070_v15 = vld [vmem:[#allocation9 + $0x1d0] sm:$0xf] }
 0x1a7   :  { %vm175_vm7 = vmor %vm173_vm6, %vm174_vm5 }
 0x1a8   :  { %v218_v21 = vsel %vm217_vm4, %v1180_v9, %v214_v18  ;;  %v169_v22 = vmul.f32 %v1182_v16, %v168_v19  ;;  %v1162_v9 = vld [vmem:[#allocation9 + $0x1e4] sm:$0xf]  ;;  %v1161_v18 = vld [vmem:[#allocation9 + $0x1d4] sm:$0xf0]  ;;  %v1144_v19 = vld [vmem:[#allocation9 + $0x154] sm:$0xf] }
 0x1a9   :  { %v219_v27 = vmul.f32 %v218_v21, %v1412_v17  ;;  %v1083_v11 = vor.u32 %v1162_v9, %v1080_v10  ;;  %v1071_v21 = vor.u32 %v1161_v18, %v1070_v15  ;;  %v1040_v9 = vld [vmem:[#allocation9 + $0x198] sm:$0xf0] }
 0x1aa   :  { %v170_v30 = vmul.f32 0.5, %v169_v22 }
 0x1ab   :  { %v220_v33 = vmul.f32 %v219_v27, %v111_v20  ;;  %741 = vmatpush.bf16.msra.mxu1 %v1071_v21  ;;  %v998_v27 = vld [vmem:[#allocation9 + $0x140] sm:$0xf]  ;;  %v114_v21 = vld [vmem:[#allocation10 + $0x3] ss:$8 sm:$0x3] }
 0x1ac   :  { %v171_v37 = vsub.f32 1.5, %v170_v30  ;;  %v999_v30 = vor.u32 %v1143_v28, %v998_v27  ;;  %v518_v25 = vperm.slane %v114_v21, 0 }
 0x1ad   :  { %v221_v40 = vadd.f32 %v220_v33, %v112_v31  ;;  %v1000_v33 = vld [vmem:[#allocation9 + $0x148] sm:$0xf0] }
 0x1ae   :  { %v172_v42 = vmul.f32 %v1182_v16, %v171_v37  ;;  %v1003_v35 = vor.u32 %v1142_v32, %v1000_v33  ;;  %v1064_v37 = vld [vmem:[#allocation9 + $0x1c8] sm:$0xf0] }
 0x1af   :  { %1183 = vtanh.f32 %v221_v40  ;;  %v1067_v38 = vor.u32 %v1158_v36, %v1064_v37  ;;  %v1141_v40 = vld [vmem:[#allocation9 + $0x134] sm:$0xf0] }
 0x1b0   :  { %v176_v17 = vsel %vm175_vm7, %v1182_v16, %v172_v42  ;;  %v1007_v16 = vor.u32 %v1145_v13, %v1006_v12  ;;  %v991_v42 = vor.u32 %v1141_v40, %v990_v39  ;;  %v116_v39 = vld [vmem:[#allocation10 + $0x4] ss:$8 sm:$0x3] }
 0x1b1   :  { %v177_v43 = vmul.f32 %v176_v17, %v1416_v24  ;;  %v1027_v24 = vor.u32 %v1148_v53, %v1024_v55  ;;  %v1157_v17 = vld [vmem:[#allocation9 + $0x1b4] sm:$0xf0]  ;;  %v1046_v53 = vld [vmem:[#allocation9 + $0x1a0] sm:$0xf]  ;;  %v1155_v55 = vld [vmem:[#allocation9 + $0x1a4] sm:$0xf0] }
 0x1b2   :  { %728 = vmatpush.bf16.msra.mxu0 %v1007_v16  ;;  %v1055_v45 = vor.u32 %v1157_v17, %v1054_v41  ;;  %v561_v40 = vperm.slane %v116_v39, 0 }
 0x1b3   :  { %v178_v48 = vmul.f32 %v177_v43, %v111_v20  ;;  %v1008_v20 = vld [vmem:[#allocation9 + $0x158] sm:$0xf0]  ;;  %v1140_v43 = vld [vmem:[#allocation9 + $0x134] sm:$0xf] }
 0x1b4   :  { %v1011_v22 = vor.u32 %v1144_v19, %v1008_v20  ;;  %v995_v46 = vor.u32 %v1140_v43, %v992_v44  ;;  %v562_v44 = vperm.slane %v116_v39, 1 }
 0x1b5   :  { %v1422_v49 = vpop.eup %1183  ;;  %v179_v50 = vadd.f32 %v178_v48, %v112_v31  ;;  %v1159_v31 = vld [vmem:[#allocation9 + $0x1c4] sm:$0xf0]  ;;  %v1056_v48 = vld [vmem:[#allocation9 + $0x1b8] sm:$0xf0] }
 0x1b6   :  { %v227_v54 = vpack.c.bf16 %v1422_v49, %v1422_v49  ;;  %v1063_v34 = vor.u32 %v1159_v31, %v1062_v29  ;;  %729 = vmatpush.bf16.msra.mxu0 %v999_v30 }
 0x1b7   :  { %1185 = vtanh.f32 %v179_v50  ;;  %v1059_v50 = vor.u32 %v1156_v47, %v1056_v48 }
 0x1b8   :  { %349 = vmatmul.bf16.vlgmr.msra.gmra.mxu2 %v227_v54  ;;  %362 = vmatmul.bf16.vlgmr.msra.gmra.mxu3 %v227_v54 }
 0x1b9   :  { %751 = vmatpush.bf16.msra.mxu2 %v1035_v51  ;;  %764 = vmatpush.bf16.msra.mxu3 %v1099_v52  ;;  %v982_v51 = vld [vmem:[#allocation9 + $0x120] sm:$0xf]  ;;  %v1139_v52 = vld [vmem:[#allocation9 + $0x124] sm:$0xf0] }
 0x1ba   :  { %742 = vmatpush.bf16.msra.mxu1 %v1063_v34  ;;  %730 = vmatpush.bf16.msra.mxu0 %v991_v42  ;;  %v983_v54 = vor.u32 %v1139_v52, %v982_v51 }
 0x1bd   :  { %v1186_v59 = vpop.eup %1185  ;;  %752 = vmatpush.bf16.msra.mxu2 %v1027_v24  ;;  %765 = vmatpush.bf16.msra.mxu3 %v1091_v58  ;;  %v1047_v24 = vor.u32 %v1155_v55, %v1046_v53  ;;  %v987_v58 = vor.u32 %v1138_v56, %v984_v57 }
 0x1be   :  { %v226_v60 = vpack.c.bf16 %v1186_v59, %v1186_v59  ;;  %743 = vmatpush.bf16.msra.mxu1 %v1055_v45  ;;  %v1154_v59 = vld [vmem:[#allocation9 + $0x1a4] sm:$0xf]  ;;  %731 = vmatpush.bf16.msra.mxu0 %v983_v54 }
 0x1c0   :  { %455 = vmatmul.bf16.vlgmr.msrb.gmra.mxu0 %v226_v60  ;;  %468 = vmatmul.bf16.vlgmr.msrb.gmra.mxu1 %v226_v60  ;;  %v1048_v60 = vld [vmem:[#allocation9 + $0x1a8] sm:$0xf0] }
 0x1c1   :  { %753 = vmatpush.bf16.msra.mxu2 %v1019_v8  ;;  %766 = vmatpush.bf16.msra.mxu3 %v1083_v11  ;;  %v1051_v61 = vor.u32 %v1154_v59, %v1048_v60  ;;  %v1152_v8 = vld [vmem:[#allocation9 + $0x194] sm:$0xf] }
 0x1c2   :  { %744 = vmatpush.bf16.msra.mxu1 %v1047_v24  ;;  %v1043_v10 = vor.u32 %v1152_v8, %v1040_v9 }
 0x1c5   :  { %754 = vmatpush.bf16.msra.mxu2 %v1011_v22  ;;  %767 = vmatpush.bf16.msra.mxu3 %v1075_v26  ;;  %v519_v26 = vperm.slane %v114_v21, 1 }
 0x1c6   :  { %745 = vmatpush.bf16.msra.mxu1 %v1039_v6 }
 0x1c8   :  { %970 = vmatmul.msk.bf16.vlgmr.msrb.gmra.mxu2 %vm485_vm9, %v228_v63  ;;  %971 = vmatmul.msk.bf16.vlgmr.msrb.gmra.mxu3 %vm485_vm9, %v228_v63  ;;  %v974_v63 = vld [vmem:[#allocation9 + $0x110] sm:$0xf] }
 0x1c9   :  { %755 = vmatpush.bf16.msra.mxu2 %v1003_v35  ;;  %768 = vmatpush.bf16.msra.mxu3 %v1067_v38  ;;  %v975_v2 = vor.u32 %v1137_v0, %v974_v63 }
 0x1cb   :  { %732 = vmatpush.bf16.msra.mxu0 %v975_v2 }
 0x1cd   :  { %756 = vmatpush.bf16.msra.mxu2 %v995_v46  ;;  %769 = vmatpush.bf16.msra.mxu3 %v1059_v50 }
 0x1d1   :  { %757 = vmatpush.bf16.msra.mxu2 %v987_v58  ;;  %770 = vmatpush.bf16.msra.mxu3 %v1051_v61 }
 0x1d5   :  { %758 = vmatpush.bf16.msra.mxu2 %v979_v7  ;;  %771 = vmatpush.bf16.msra.mxu3 %v1043_v10 }
 0x23b   :  { %v350_v11 = vpop.f32.mrf.mxu2  ;;  %v363_v12 = vpop.f32.mrf.mxu3 }
 0x23d   :  { %v456_v13 = vpop.f32.mrf.mxu0  ;;  %v469_v15 = vpop.f32.mrf.mxu1 }
 0x23e   :  { %v457_v22 = vadd.f32 %v456_v13, %v350_v11  ;;  %v470_v23 = vadd.f32 %v469_v15, %v363_v12 }
 0x243   :  { %v352_v16 = vpop.f32.mrf.mxu2  ;;  %v365_v18 = vpop.f32.mrf.mxu3 }
 0x245   :  { %v458_v19 = vpop.f32.mrf.mxu0  ;;  %v471_v20 = vpop.f32.mrf.mxu1 }
 0x24b   :  { %v498_v27 = vpop.f32.mrf.mxu2  ;;  %v511_v28 = vpop.f32.mrf.mxu3 }
 0x24c   :  { %v515_v29 = vadd.f32 %v498_v27, %v457_v22  ;;  %v516_v30 = vadd.f32 %v511_v28, %v470_v23 }
 0x24e   :  { %v522_v31 = vadd.f32 %v518_v25, %v515_v29  ;;  %v523_v32 = vadd.f32 %v519_v26, %v516_v30 }
 0x250   :  { %v524_v33 = vmax.f32 %v522_v31, 0.0  ;;  %v525_v34 = vmax.f32 %v523_v32, 0.0 }
 0x252   :  { %v526_v35 = vpack.c.bf16 %v524_v33, %v524_v33  ;;  %v527_v36 = vpack.c.bf16 %v525_v34, %v525_v34 }
 0x253   :  { %v500_v37 = vpop.f32.mrf.mxu2  ;;  %v513_v38 = vpop.f32.mrf.mxu3 }
 0x254   :  { %733 = vmatmul.bf16.vlgmr.msra.gmra.mxu0 %v526_v35  ;;  %746 = vmatmul.bf16.vlgmr.msra.gmra.mxu1 %v527_v36 }
 0x255   :  { %759 = vmatmul.bf16.vlgmr.msra.gmra.mxu2 %v526_v35  ;;  %772 = vmatmul.bf16.vlgmr.msra.gmra.mxu3 %v527_v36 }
 0x2d1   :  { %v734_v41 = vpop.f32.mrf.mxu0  ;;  %v747_v42 = vpop.f32.mrf.mxu1 }
 0x2d2   :  { %v735_v17 = vadd.f32 %v734_v41, %v561_v40 }
 0x2d4   :  { %v748_v43 = vadd.f32 %v747_v42, %v735_v17 }
 0x2d6   :  { %v778_v45 = vsub.f32 %v1422_v49, %v748_v43 }
 0x2d8   :  { %v760_v46 = vpop.f32.mrf.mxu2  ;;  %v773_v47 = vpop.f32.mrf.mxu3  ;;  %v780_v48 = vmul.f32 %v778_v45, %v778_v45 }
 0x2d9   :  { %v761_v50 = vadd.f32 %v760_v46, %v562_v44  ;;  %v736_v51 = vpop.f32.mrf.mxu0  ;;  %v749_v52 = vpop.f32.mrf.mxu1 }
 0x2da   :  { %781 = vadd.xlane.f32.xlu2 %v780_v48 }
 0x2db   :  { %v774_v53 = vadd.f32 %v773_v47, %v761_v50 }
 0x2dd   :  { %1187 = vtanh.f32 %v774_v53 }
 0x2e0   :  { %v762_v54 = vpop.f32.mrf.mxu2  ;;  %v775_v55 = vpop.f32.mrf.mxu3 }
 0x2e3   :  { %v1188_v56 = vpop.eup %1187 }
 0x2e4   :  { %v779_v57 = vsub.f32 %v1426_v62, %v1188_v56 }
 0x2e6   :  { %v795_v24 = vmul.f32 %v779_v57, %v779_v57 }
 0x2e8   :  { %v796_v58 = vsel %vm485_vm9, %v795_v24, 0.0 }
 0x2e9   :  { %797 = vadd.xlane.f32.xlu2 %v796_v58 }
 0x34d   :  { %v782_v59 = vpop.xlane.xlu2 %781 }
 0x34e   :  { %1189 = vrsqrt.f32 %v782_v59  ;;  %vm790_vm10 = vcmp.eq.f32.partialorder %v782_v59, inf  ;;  %v793_v11 = vand.u32 2147483648, %v782_v59  ;;  %vm792_vm13 = vcmp.eq.f32.partialorder %v782_v59, 0.0 }
 0x354   :  { %v1190_v49 = vpop.eup %1189 }
 0x355   :  { %v784_v60 = vmul.f32 %v1190_v49, %v782_v59 }
 0x357   :  { %v785_v61 = vmul.f32 %v1190_v49, %v784_v60 }
 0x359   :  { %v786_v0 = vmul.f32 0.5, %v785_v61 }
 0x35b   :  { %v787_v1 = vsub.f32 1.5, %v786_v0 }
 0x35c   :  { %v798_v63 = vpop.xlane.xlu2 %797 }
 0x35d   :  { %1191 = vrsqrt.f32 %v798_v63  ;;  %v788_v4 = vmul.f32 %v1190_v49, %v787_v1  ;;  %vm806_vm12 = vcmp.eq.f32.partialorder %v798_v63, inf  ;;  %v809_v12 = vand.u32 2147483648, %v798_v63 }
 0x35e   :  { %vm808_vm15 = vcmp.eq.f32.partialorder %v798_v63, 0.0 }
 0x35f   :  { %v789_v7 = vmul.f32 %v788_v4, %v782_v59 }
 0x361   :  { %v791_v9 = vsel %vm790_vm10, %v782_v59, %v789_v7 }
 0x362   :  { %v794_v15 = vsel %vm792_vm13, %v793_v11, %v791_v9 }
 0x363   :  { %v1192_v2 = vpop.eup %1191 }
 0x364   :  { %v800_v3 = vmul.f32 %v1192_v2, %v798_v63 }
 0x366   :  { %v801_v5 = vmul.f32 %v1192_v2, %v800_v3 }
 0x368   :  { %v802_v6 = vmul.f32 0.5, %v801_v5 }
 0x36a   :  { %v803_v62 = vsub.f32 1.5, %v802_v6 }
 0x36c   :  { %v804_v8 = vmul.f32 %v1192_v2, %v803_v62 }
 0x36e   :  { %v805_v10 = vmul.f32 %v804_v8, %v798_v63 }
 0x370   :  { %v807_v13 = vsel %vm806_vm12, %v798_v63, %v805_v10 }
 0x371   :  { %v810_v16 = vsel %vm808_vm15, %v809_v12, %v807_v13 }
 0x372   :  { %v812_v18 = vsel %vm811_vm11, %v794_v15, %v810_v16 }
 0x373   :  { %814 = vst.msk [vmem:[%s1445_s6] sm:$0xff] %vm813_vm14, %v812_v18 }
 0x374   :  { %819 = vsyncpa [#allocation3], 1 }
 0x375   :  { %820 = vsyncpa [#allocation5], 1 }
 0x376   :  { %821 = vsyncpa [#allocation8], 1 }
 0x377   :  { %822 = vsyncpa [#allocation11], 1 }

</bundles_post_ra>
